<compile_context>
chip_gen: v5e
topology: v5e:2x2
jax: 0.10.0
libtpu: 0.0.40
codegen_flags: <defaults>
</compile_context>

<pallas_src>
import functools

import jax
import jax.numpy as jnp
from jax.experimental import pallas as pl
from jax.experimental.pallas import tpu as pltpu


# ----------------------------------------------------------------------------
# small helpers
# ----------------------------------------------------------------------------
def _cdiv(a, b):
    return (a + b - 1) // b


def _round_up(x, m):
    return ((x + m - 1) // m) * m


def _pad_vec(v, n):
    v = v.astype(jnp.float32)
    if v.shape[0] == n:
        return v
    return jnp.pad(v, (0, n - v.shape[0]))


def _pad_mat(w, rows, cols):
    r, c = w.shape
    if r == rows and c == cols:
        return w
    return jnp.pad(w, ((0, rows - r), (0, cols - c)))


def _device_kind():
    try:
        return jax.devices()[0].device_kind.lower()
    except Exception:
        return ""


def _mxu_width():
    k = _device_kind()
    if any(t in k for t in ("v2", "v3", "v4", "v5")):
        return 128
    return 256            # v6e / v7x default


def _is_v7():
    k = _device_kind()
    return ("v7" in k) or ("7x" in k)


def _pick_hw_tile(hw, cap):
    """Largest divisor of hw that is <= cap and a multiple of 8 (else hw)."""
    for t in range(min(cap, hw), 7, -1):
        if hw % t == 0 and t % 8 == 0:
            return t
    return hw


def _pick_band_h(H, W, cap_rows=512):
    """Row-band height: divisor of H with band_h*W <= cap_rows and 8-aligned."""
    cands = [bh for bh in range(1, H + 1) if H % bh == 0 and (bh * W) % 8 == 0]
    if not cands:
        return H
    small = [bh for bh in cands if bh * W <= cap_rows]
    return max(small) if small else min(cands)


def _bn_fold(gamma, beta, mean, var, eps=1e-5):
    scale = gamma / jnp.sqrt(var + eps)
    bias = beta - scale * mean
    return scale, bias


# ----------------------------------------------------------------------------
# Kernel 1: fused matmul + per-channel affine (+ ReLU)   (used for conv1+BN)
# ----------------------------------------------------------------------------
def _mm_affine_kernel(x_ref, w_ref, s_ref, b_ref, o_ref, *, relu):
    acc = jnp.dot(x_ref[...], w_ref[...], preferred_element_type=jnp.float32)
    acc = acc * s_ref[...] + b_ref[...]
    if relu:
        acc = jnp.maximum(acc, 0.0)
    o_ref[...] = acc.astype(o_ref.dtype)


def matmul_affine(x, w, scale, bias, *, relu=False, out_dtype=jnp.bfloat16,
                  compute_dtype=jnp.bfloat16, row_tile=1024, mxu_w=256):
    """[relu]((x @ w) * scale + bias); w columns must be a multiple of 128.

    No HBM row-padding pass: the row tile is the largest divisor of M that is
    a multiple of 8 (or M itself).  Output columns stay padded (lane-dense).
    """
    M, K = x.shape
    Kw, Np = w.shape
    assert K == Kw and Np % 128 == 0

    tm = M
    for t in range(min(row_tile, M), 7, -1):
        if M % t == 0 and t % 8 == 0:
            tm = t
            break
    tn = 256 if (mxu_w >= 256 and Np % 256 == 0) else 128
    grid = (M // tm, Np // tn)

    return pl.pallas_call(
        functools.partial(_mm_affine_kernel, relu=relu),
        out_shape=jax.ShapeDtypeStruct((M, Np), out_dtype),
        grid=grid,
        in_specs=[
            pl.BlockSpec((tm, K), lambda i, j: (i, 0)),
            pl.BlockSpec((K, tn), lambda i, j: (0, j)),
            pl.BlockSpec((1, tn), lambda i, j: (0, j)),
            pl.BlockSpec((1, tn), lambda i, j: (0, j)),
        ],
        out_specs=pl.BlockSpec((tm, tn), lambda i, j: (i, j)),
        compiler_params=pltpu.CompilerParams(
            dimension_semantics=("parallel", "parallel")),
    )(x.astype(compute_dtype), w.astype(compute_dtype),
      scale.reshape(1, Np).astype(jnp.float32),
      bias.reshape(1, Np).astype(jnp.float32))


# ----------------------------------------------------------------------------
# Kernel 2: all SKConv branches in one call.
#   grid = (image, branch); branch innermost so the activation block is DMA'd
#   once per image.  The dilated grouped 3x3 conv + folded BN + ReLU runs
#   band-by-band (bounded f32 accumulator).  GAP partial sums are accumulated
#   across the branch axis into a single (N, 1, Cp) output.
# ----------------------------------------------------------------------------
def _branch_conv_kernel(y_ref, w_ref, s_ref, b_ref, feat_ref, gap_ref, xp_buf, *,
                        H, W, pad, padw_l, groups, per_group, band_h,
                        num_branches):
    b_idx = pl.program_id(1)
    Cp = feat_ref.shape[-1]
    rows = band_h * W
    n_bands = H // band_h

    # Refresh the padded activation buffer once per image (first branch only):
    # zero the buffer (halo stays zero) and copy the interior from the block.
    @pl.when(b_idx == 0)
    def _():
        xp_buf[...] = jnp.zeros_like(xp_buf)
        xp_buf[pad:pad + H, padw_l:padw_l + W, :] = y_ref[...]

    def one_branch(dil, first):
        scale = s_ref[...]
        bias = b_ref[...]
        gap_acc = jnp.zeros((1, Cp), jnp.float32)
        for hb in range(n_bands):
            def tap(ky, kx, hb=hb, dil=dil):
                r0 = pad + hb * band_h + (ky - 1) * dil
                c0 = padw_l + (kx - 1) * dil
                t = xp_buf[r0:r0 + band_h, c0:c0 + W, :]
                return t.reshape(rows, Cp)

            if per_group:
                cg = Cp // groups
                accs = [jnp.zeros((rows, cg), jnp.float32) for _ in range(groups)]
                for ky in range(3):
                    for kx in range(3):
                        t_full = tap(ky, kx)      # hoisted out of the group loop
                        for g in range(groups):
                            accs[g] = accs[g] + jnp.dot(
                                t_full[:, g * cg:(g + 1) * cg],
                                w_ref[ky * 3 + kx, g],
                                preferred_element_type=jnp.float32)
                acc = jnp.concatenate(accs, axis=-1)
            else:                                  # dense block-diagonal weights
                acc = jnp.zeros((rows, Cp), jnp.float32)
                for ky in range(3):
                    for kx in range(3):
                        acc = acc + jnp.dot(tap(ky, kx), w_ref[ky * 3 + kx],
                                            preferred_element_type=jnp.float32)

            yb = jnp.maximum(acc * scale + bias, 0.0)   # folded BN + ReLU (f32)
            feat_ref[hb * rows:(hb + 1) * rows, :] = yb.astype(feat_ref.dtype)
            gap_acc = gap_acc + jnp.sum(yb, axis=0, keepdims=True)

        if first:
            gap_ref[...] = gap_acc
        else:
            gap_ref[...] = gap_ref[...] + gap_acc

    # Static dispatch over the branch index so dilation offsets stay static.
    for i in range(num_branches):
        @pl.when(b_idx == i)
        def _(i=i):
            one_branch(dil=1 + i, first=(i == 0))


def branch_conv_all(y, w_stack, s_stack, b_stack, *, H, W, pad, groups,
                    per_group, num_branches, out_dtype=jnp.bfloat16,
                    compute_dtype=jnp.bfloat16, band_rows_cap=512):
    N = y.shape[0]
    cp = y.shape[-1]
    HW = H * W
    band_h = _pick_band_h(H, W, band_rows_cap)
    padw_l = _round_up(pad, 8)        # sublane-aligned interior start in W
    Hp = H + 2 * pad
    Wp = padw_l + W + pad

    kernel = functools.partial(
        _branch_conv_kernel, H=H, W=W, pad=pad, padw_l=padw_l, groups=groups,
        per_group=per_group, band_h=band_h, num_branches=num_branches)

    if per_group:
        w_spec = pl.BlockSpec((None,) + tuple(w_stack.shape[1:]),
                              lambda n, b: (b, 0, 0, 0, 0))
    else:
        w_spec = pl.BlockSpec((None,) + tuple(w_stack.shape[1:]),
                              lambda n, b: (b, 0, 0, 0))

    feats, gap = pl.pallas_call(
        kernel,
        out_shape=(jax.ShapeDtypeStruct((N * num_branches, HW, cp), out_dtype),
                   jax.ShapeDtypeStruct((N, 1, cp), jnp.float32)),
        grid=(N, num_branches),
        in_specs=[
            pl.BlockSpec((None, H, W, cp), lambda n, b: (n, 0, 0, 0)),
            w_spec,
            pl.BlockSpec((None, 1, cp), lambda n, b: (b, 0, 0)),
            pl.BlockSpec((None, 1, cp), lambda n, b: (b, 0, 0)),
        ],
        out_specs=(
            pl.BlockSpec((None, HW, cp),
                         lambda n, b: (n * num_branches + b, 0, 0)),
            pl.BlockSpec((None, 1, cp), lambda n, b: (n, 0, 0)),
        ),
        scratch_shapes=[pltpu.VMEM((Hp, Wp, cp), compute_dtype)],
        compiler_params=pltpu.CompilerParams(
            dimension_semantics=("parallel", "arbitrary"),
            vmem_limit_bytes=48 * 1024 * 1024),
    )(y.astype(compute_dtype), w_stack.astype(compute_dtype),
      s_stack.astype(jnp.float32), b_stack.astype(jnp.float32))
    return feats.reshape(N, num_branches, HW, cp), gap


# ----------------------------------------------------------------------------
# Kernel 3: softmax-weighted branch fusion + post-BN + final 1x1 conv + final
# BN, tiled over (batch, HW tiles).  Softmax weights are precomputed (XLA).
# ----------------------------------------------------------------------------
def _sk_fuse_conv_kernel(feat_ref, p_ref, sp_ref, bp_ref, w2_ref, so_ref,
                         bo_ref, o_ref, *, num_branches):
    v = feat_ref[0].astype(jnp.float32) * p_ref[0:1, :]
    for b in range(1, num_branches):
        v = v + feat_ref[b].astype(jnp.float32) * p_ref[b:b + 1, :]
    v = v * sp_ref[...] + bp_ref[...]                 # BN after SKConv
    out = jnp.dot(v.astype(w2_ref.dtype), w2_ref[...],
                  preferred_element_type=jnp.float32)  # final 1x1 conv
    out = out * so_ref[...] + bo_ref[...]              # final BN
    o_ref[...] = out.astype(o_ref.dtype)


def sk_fuse_conv(feats, p, sp, bp, w2, so, bo, *, out_dtype=jnp.bfloat16,
                 compute_dtype=jnp.bfloat16, hw_tile_cap=1024):
    N, B, HW, cp = feats.shape
    op = w2.shape[1]
    t_hw = _pick_hw_tile(HW, hw_tile_cap)
    grid = (N, HW // t_hw)

    return pl.pallas_call(
        functools.partial(_sk_fuse_conv_kernel, num_branches=B),
        out_shape=jax.ShapeDtypeStruct((N, HW, op), out_dtype),
        grid=grid,
        in_specs=[
            pl.BlockSpec((None, B, t_hw, cp), lambda n, h: (n, 0, h, 0)),
            pl.BlockSpec((None, B, cp), lambda n, h: (n, 0, 0)),
            pl.BlockSpec((1, cp), lambda n, h: (0, 0)),
            pl.BlockSpec((1, cp), lambda n, h: (0, 0)),
            pl.BlockSpec((cp, op), lambda n, h: (0, 0)),
            pl.BlockSpec((1, op), lambda n, h: (0, 0)),
            pl.BlockSpec((1, op), lambda n, h: (0, 0)),
        ],
        out_specs=pl.BlockSpec((None, t_hw, op), lambda n, h: (n, h, 0)),
        compiler_params=pltpu.CompilerParams(
            dimension_semantics=("parallel", "parallel"),
            vmem_limit_bytes=48 * 1024 * 1024),
    )(feats, p.astype(jnp.float32),
      sp.reshape(1, cp).astype(jnp.float32), bp.reshape(1, cp).astype(jnp.float32),
      w2.astype(compute_dtype),
      so.reshape(1, op).astype(jnp.float32), bo.reshape(1, op).astype(jnp.float32))


# ----------------------------------------------------------------------------
# weight prep (grouped 3x3 conv)
# ----------------------------------------------------------------------------
def _branch_weight_dense(w, groups, cpad):
    """torch grouped weight (Cout, Cin/g, 3, 3) -> per-tap block-diag (9, cpad, cpad)."""
    cout, cin_g, kh, kw = w.shape
    og = cout // groups
    wt = jnp.zeros((kh * kw, cpad, cpad), jnp.float32)
    for g in range(groups):
        blk = jnp.transpose(w[g * og:(g + 1) * og], (2, 3, 1, 0))
        blk = blk.reshape(kh * kw, cin_g, og)
        wt = wt.at[:, g * cin_g:(g + 1) * cin_g, g * og:(g + 1) * og].set(blk)
    return wt


def _branch_weight_grouped(w, groups):
    """torch grouped weight -> (9, groups, Cin/g, Cout/g) for per-group matmuls."""
    cout, cin_g, kh, kw = w.shape
    og = cout // groups
    blocks = []
    for g in range(groups):
        blk = jnp.transpose(w[g * og:(g + 1) * og], (2, 3, 1, 0))
        blocks.append(blk.reshape(kh * kw, cin_g, og))
    return jnp.stack(blocks, axis=1)


# ----------------------------------------------------------------------------
# parameters (inference-mode BatchNorm running stats)
# ----------------------------------------------------------------------------
def init_params(key, in_channels, out_channels, mid_channels, branches, groups,
                down_ratio, min_dim=32):
    d = max(int(mid_channels / down_ratio), min_dim)
    keys = iter(jax.random.split(key, 128))

    def w(shape, s=0.1):
        return jax.random.normal(next(keys), shape, jnp.float32) * s

    def bn(c):
        return dict(
            gamma=1.0 + 0.1 * jax.random.normal(next(keys), (c,), jnp.float32),
            beta=0.1 * jax.random.normal(next(keys), (c,), jnp.float32),
            mean=0.1 * jax.random.normal(next(keys), (c,), jnp.float32),
            var=jax.random.uniform(next(keys), (c,), jnp.float32, 0.5, 1.5),
        )

    return dict(
        d=d,
        conv1_w=w((mid_channels, in_channels, 1, 1)),
        conv1_b=w((mid_channels,)),
        bn1=bn(mid_channels),
        branches=[dict(conv_w=w((mid_channels, mid_channels // groups, 3, 3)),
                       conv_b=w((mid_channels,)),
                       bn=bn(mid_channels)) for _ in range(branches)],
        fc_w=w((d, mid_channels)), fc_b=w((d,)), fc_bn=bn(d),
        fcs=[dict(w=w((mid_channels, d)), b=w((mid_channels,)))
             for _ in range(branches)],
        bn_post=bn(mid_channels),
        conv2_w=w((out_channels, mid_channels, 1, 1)),
        conv2_b=w((out_channels,)),
        bn_out=bn(out_channels),
    )


# ----------------------------------------------------------------------------
# full SKUnit forward
# ----------------------------------------------------------------------------
def sk_unit_forward(x_nchw, params, *, groups, stride=1):
    # TODO(synk): stride > 1 not implemented (row-flattened layout assumes stride == 1).
    assert stride == 1
    N, Cin, H, W = x_nchw.shape
    HW = H * W
    B = len(params["branches"])
    mid = params["conv1_w"].shape[0]
    out_ch = params["conv2_w"].shape[0]

    cp = _round_up(mid, 128)        # lane-dense padded mid channels
    op = _round_up(out_ch, 128)     # lane-dense padded output channels

    # MXU-width aware per-group vs dense block-diagonal decision.
    mxu_w = _mxu_width()
    lane_ok = (mid % groups == 0) and (mid == cp) and ((mid // groups) % 128 == 0)
    if lane_ok:
        cg = mid // groups
        per_group = groups * (_cdiv(cg, mxu_w) ** 2) < (_cdiv(cp, mxu_w) ** 2)
    else:
        per_group = False

    # NCHW -> rows x lanes (only conversion at the unit boundary; a chained
    # SKUnit stack would keep the padded NHWC layout between units).
    x = jnp.transpose(x_nchw, (0, 2, 3, 1)).reshape(N * HW, Cin)

    # --- 1x1 conv + BatchNorm (no activation) ---
    s1, b1 = _bn_fold(**params["bn1"])
    w1 = _pad_mat(params["conv1_w"][:, :, 0, 0].T, Cin, cp)           # (Cin, cp)
    y = matmul_affine(x, w1, _pad_vec(s1, cp),
                      _pad_vec(s1 * params["conv1_b"] + b1, cp),
                      relu=False, out_dtype=jnp.bfloat16, mxu_w=mxu_w)
    y = y.reshape(N, H, W, cp)      # free metadata reshape (no pad pass)

    # --- SKConv branches (merged kernel): dilated grouped 3x3 + BN + ReLU,
    #     with GAP partial sums accumulated across the branch grid axis.
    if per_group:
        w_stack = jnp.stack([_branch_weight_grouped(bp["conv_w"], groups)
                             for bp in params["branches"]], axis=0)
    else:
        w_stack = jnp.stack([_branch_weight_dense(bp["conv_w"], groups, cp)
                             for bp in params["branches"]], axis=0)
    s_list, b_list = [], []
    for bp in params["branches"]:
        sb, bb = _bn_fold(**bp["bn"])
        s_list.append(_pad_vec(sb, cp))
        b_list.append(_pad_vec(sb * bp["conv_b"] + bb, cp))
    s_stack = jnp.stack(s_list, 0).reshape(B, 1, cp)
    b_stack = jnp.stack(b_list, 0).reshape(B, 1, cp)

    band_cap = 256 if _is_v7() else 512
    feats, gap = branch_conv_all(y, w_stack, s_stack, b_stack, H=H, W=W,
                                 pad=B, groups=groups, per_group=per_group,
                                 num_branches=B, band_rows_cap=band_cap)

    # --- tiny attention chain in plain XLA (few-KB tensors; exact softmax) ---
    s_vec = gap[:, 0, :mid] * (1.0 / HW)                              # (N, mid)
    sfc, bfc = _bn_fold(**params["fc_bn"])
    z = jnp.maximum((s_vec @ params["fc_w"].T) * sfc
                    + (sfc * params["fc_b"] + bfc), 0.0)              # (N, d)
    att = jnp.stack([z @ fp["w"].T + fp["b"] for fp in params["fcs"]],
                    axis=1)                                           # (N, B, mid)
    p = jax.nn.softmax(att, axis=1)
    p = jnp.pad(p, ((0, 0), (0, 0), (0, cp - mid)))                   # (N, B, cp)

    # --- weighted fusion + post-BN + 1x1 conv2 + final BN (fused kernel) ---
    sp_, bpst = _bn_fold(**params["bn_post"])
    s2, b2 = _bn_fold(**params["bn_out"])
    w2 = _pad_mat(params["conv2_w"][:, :, 0, 0].T, cp, op)            # (cp, op)
    hw_cap = 512 if _is_v7() else 1024
    out = sk_fuse_conv(feats, p, _pad_vec(sp_, cp), _pad_vec(bpst, cp),
                       w2, _pad_vec(s2, op),
                       _pad_vec(s2 * params["conv2_b"] + b2, op),
                       out_dtype=jnp.bfloat16, hw_tile_cap=hw_cap)    # (N, HW, op)

    out = out[:, :, :out_ch].reshape(N, H, W, out_ch).astype(jnp.float32)
    return jnp.transpose(out, (0, 3, 1, 2))                           # NCHW f32


# ----------------------------------------------------------------------------
if __name__ == "__main__":
    key = jax.random.PRNGKey(0)
    kx, kp = jax.random.split(key)

    N, Cin, H, W = 2, 4, 16, 16
    out_channels, mid_channels = 8, 32
    branches, groups, down_ratio = 2, 2, 4

    x = jax.random.normal(kx, (N, Cin, H, W), jnp.float32)
    params = init_params(kp, Cin, out_channels, mid_channels,
                         branches, groups, down_ratio)

    y = sk_unit_forward(x, params, groups=groups)
    y = jax.block_until_ready(y)
    assert y.shape == (N, out_channels, H, W), y.shape
    assert bool(jnp.all(jnp.isfinite(y)))
    print("KERNEL_OK")
</pallas_src>

<mosaic_0001>
module attributes {stable_mosaic.version = 11 : i64} {
  func.func @_mm_affine_kernel(%arg0: i32, %arg1: i32, %arg2: memref<512x4xbf16, #tpu.memory_space<vmem>>, %arg3: memref<4x128xbf16, #tpu.memory_space<vmem>>, %arg4: memref<1x128xf32, #tpu.memory_space<vmem>>, %arg5: memref<1x128xf32, #tpu.memory_space<vmem>>, %arg6: memref<512x128xbf16, #tpu.memory_space<vmem>>) attributes {dimension_semantics = [#tpu.dimension_semantics<parallel>, #tpu.dimension_semantics<parallel>], iteration_bounds = array<i64: 1, 1>, scalar_prefetch = 0 : i64, scratch_operands = 0 : i64, tpu.core_type = #tpu.core_type<tc>, window_params = [{transform_indices = @transform_0, window_bounds = array<i64: 512, 4>}, {transform_indices = @transform_1, window_bounds = array<i64: 4, 128>}, {transform_indices = @transform_2, window_bounds = array<i64: 1, 128>}, {transform_indices = @transform_3, window_bounds = array<i64: 1, 128>}, {transform_indices = @transform_4, window_bounds = array<i64: 512, 128>}]} {
    %c0 = arith.constant 0 : index
    %c0_0 = arith.constant 0 : index
    %0 = vector.load %arg2[%c0, %c0_0] : memref<512x4xbf16, #tpu.memory_space<vmem>>, vector<512x4xbf16>
    %c0_1 = arith.constant 0 : index
    %c0_2 = arith.constant 0 : index
    %1 = vector.load %arg3[%c0_1, %c0_2] : memref<4x128xbf16, #tpu.memory_space<vmem>>, vector<4x128xbf16>
    %cst = arith.constant dense<0.000000e+00> : vector<512x128xf32>
    %2 = tpu.matmul %0, %1, %cst {dimension_numbers = #tpu.dot_dimension_numbers<[1], [0], [0], [1], [0, 0, 1, 1], [], []>} : vector<512x4xbf16>, vector<4x128xbf16>, vector<512x128xf32> -> vector<512x128xf32>
    %c0_3 = arith.constant 0 : index
    %c0_4 = arith.constant 0 : index
    %3 = vector.load %arg4[%c0_3, %c0_4] : memref<1x128xf32, #tpu.memory_space<vmem>>, vector<1x128xf32>
    %4 = vector.broadcast %3 : vector<1x128xf32> to vector<512x128xf32>
    %5 = arith.mulf %2, %4 : vector<512x128xf32>
    %c0_5 = arith.constant 0 : index
    %c0_6 = arith.constant 0 : index
    %6 = vector.load %arg5[%c0_5, %c0_6] : memref<1x128xf32, #tpu.memory_space<vmem>>, vector<1x128xf32>
    %7 = vector.broadcast %6 : vector<1x128xf32> to vector<512x128xf32>
    %8 = arith.addf %5, %7 : vector<512x128xf32>
    %9 = arith.truncf %8 : vector<512x128xf32> to vector<512x128xbf16>
    %c0_7 = arith.constant 0 : index
    %c0_8 = arith.constant 0 : index
    %10 = vector.load %arg6[%c0_7, %c0_8] : memref<512x128xbf16, #tpu.memory_space<vmem>>, vector<512x128xbf16>
    tpu.vector_store %arg6[%c0_7, %c0_8], %9 {strides = array<i32>} : memref<512x128xbf16, #tpu.memory_space<vmem>>, vector<512x128xbf16>,
    return
  }
  func.func @transform_0(%arg0: i32, %arg1: i32) -> (i32, i32) {
    %c0_i32 = arith.constant 0 : i32
    %c0_i32_0 = arith.constant 0 : i32
    return %arg0, %c0_i32 : i32, i32
  }
  func.func @transform_1(%arg0: i32, %arg1: i32) -> (i32, i32) {
    %c0_i32 = arith.constant 0 : i32
    %c0_i32_0 = arith.constant 0 : i32
    return %c0_i32, %arg1 : i32, i32
  }
  func.func @transform_2(%arg0: i32, %arg1: i32) -> (i32, i32) {
    %c0_i32 = arith.constant 0 : i32
    %c0_i32_0 = arith.constant 0 : i32
    return %c0_i32, %arg1 : i32, i32
  }
  func.func @transform_3(%arg0: i32, %arg1: i32) -> (i32, i32) {
    %c0_i32 = arith.constant 0 : i32
    %c0_i32_0 = arith.constant 0 : i32
    return %c0_i32, %arg1 : i32, i32
  }
  func.func @transform_4(%arg0: i32, %arg1: i32) -> (i32, i32) {
    %c0_i32 = arith.constant 0 : i32
    return %arg0, %arg1 : i32, i32
  }
}

</mosaic_0001>

<bundles_post_ra>
// kernel: tpu_custom_call.1
= control target key start
LH: loop header
LB: loop body
LE: loop exit
PB: predicated region body
PF: predicated region fallthrough
CT: control target
= control target key end

     0   :  { %vm341_vm0 = vcmask 1041408   ;;  %vm244_vm1 = vcmask 31744   ;;  %s1513_s0 = inlined_call_operand.vmem [shape: bf16[512,4], index: 0, kind: input, shape index: {}]   ;;  %s1514_s1 = inlined_call_operand.vmem [shape: bf16[4,128], index: 1, kind: input, shape index: {}]   ;;  %s1515_s2 = inlined_call_operand.vmem [shape: f32[1,128], index: 2, kind: input, shape index: {}]   ;;  %s1516_s3 = inlined_call_operand.vmem [shape: f32[1,128], index: 3, kind: input, shape index: {}]   ;;  %s1517_s4 = inlined_call_operand.hbm [shape: bf16[512,128], index: 4, kind: output, shape index: {}]  }
   0x1   :  { %v83_v0 = vld [vmem:[%s1514_s1] sm:$0x3] }
   0x2   :  { %v343_v1 = vsel %vm341_vm0, %v83_v0, 0  ;;  %v956_v2 = vld [vmem:[%s1513_s0] sm:$0xff] }
   0x3   :  { %v964_v3 = vld [vmem:[%s1513_s0 + $0x40] sm:$0xff]  ;;  %352 = vmatpush.bf16.msra.mxu0 %v343_v1  ;;  %1179 = vmatpush.bf16.msra.mxu1 %v343_v1 }
   0x4   :  { %v972_v4 = vld [vmem:[%s1513_s0 + $0x80] sm:$0xff]  ;;  %1180 = vmatpush.bf16.msra.mxu2 %v343_v1  ;;  %1181 = vmatpush.bf16.msra.mxu3 %v343_v1 }
   0x5   :  { %v980_v5 = vld [vmem:[%s1513_s0 + $0xc0] sm:$0xff] }
   0x6   :  { %924 = vmatmul.msk.bf16.vlgmr.msra.gmra.mxu0 %vm244_vm1, %v956_v2  ;;  %932 = vmatmul.msk.bf16.vlgmr.msra.gmra.mxu1 %vm244_vm1, %v964_v3 }
   0x7   :  { %9 = vsyncpa [#allocation3], 0  ;;  %940 = vmatmul.msk.bf16.vlgmr.msra.gmra.mxu2 %vm244_vm1, %v972_v4  ;;  %948 = vmatmul.msk.bf16.vlgmr.msra.gmra.mxu3 %vm244_vm1, %v980_v5  ;;  %v957_v6 = vld [vmem:[%s1513_s0 + $0x8] sm:$0xff]  ;;  %v958_v10 = vld [vmem:[%s1513_s0 + $0x10] sm:$0xff]  ;;  %s784_s5 = sshll.u32 %s1517_s4, 4  ;;  %s1214_s6 = smov 64   ;;  %s785_s5 = int_to_ptr.hbm [resolvable:$true] %s784_s5 }
   0x8   :  { %v965_v7 = vld [vmem:[%s1513_s0 + $0x48] sm:$0xff]  ;;  %v966_v11 = vld [vmem:[%s1513_s0 + $0x50] sm:$0xff]  ;;  %v959_v14 = vld [vmem:[%s1513_s0 + $0x18] sm:$0xff]  ;;  %s1215_s7 = smov 4  }
   0x9   :  { %v973_v8 = vld [vmem:[%s1513_s0 + $0x88] sm:$0xff]  ;;  %v974_v12 = vld [vmem:[%s1513_s0 + $0x90] sm:$0xff]  ;;  %v967_v15 = vld [vmem:[%s1513_s0 + $0x58] sm:$0xff] }
   0xa   :  { %v981_v9 = vld [vmem:[%s1513_s0 + $0xc8] sm:$0xff]  ;;  %v982_v13 = vld [vmem:[%s1513_s0 + $0xd0] sm:$0xff]  ;;  %v975_v16 = vld [vmem:[%s1513_s0 + $0x98] sm:$0xff] }
   0xb   :  { %v983_v17 = vld [vmem:[%s1513_s0 + $0xd8] sm:$0xff]  ;;  %v960_v18 = vld [vmem:[%s1513_s0 + $0x20] sm:$0xff]  ;;  %v961_v22 = vld [vmem:[%s1513_s0 + $0x28] sm:$0xff] }
   0xc   :  { %v968_v19 = vld [vmem:[%s1513_s0 + $0x60] sm:$0xff]  ;;  %v969_v23 = vld [vmem:[%s1513_s0 + $0x68] sm:$0xff]  ;;  %v962_v26 = vld [vmem:[%s1513_s0 + $0x30] sm:$0xff] }
   0xd   :  { %v976_v20 = vld [vmem:[%s1513_s0 + $0xa0] sm:$0xff]  ;;  %v977_v24 = vld [vmem:[%s1513_s0 + $0xa8] sm:$0xff]  ;;  %v970_v27 = vld [vmem:[%s1513_s0 + $0x70] sm:$0xff] }
   0xe   :  { %v984_v21 = vld [vmem:[%s1513_s0 + $0xe0] sm:$0xff]  ;;  %v985_v25 = vld [vmem:[%s1513_s0 + $0xe8] sm:$0xff]  ;;  %v978_v28 = vld [vmem:[%s1513_s0 + $0xb0] sm:$0xff] }
   0xf   :  { %v986_v29 = vld [vmem:[%s1513_s0 + $0xf0] sm:$0xff]  ;;  %v963_v30 = vld [vmem:[%s1513_s0 + $0x38] sm:$0xff]  ;;  %v1375_v36 = vld [vmem:[%s1515_s2] ss:$0 sm:$0xff] }
  0x10   :  { %v971_v31 = vld [vmem:[%s1513_s0 + $0x78] sm:$0xff]  ;;  %v1381_v38 = vld [vmem:[%s1516_s3] ss:$0 sm:$0xff] }
  0x11   :  { %v979_v32 = vld [vmem:[%s1513_s0 + $0xb8] sm:$0xff] }
  0x12   :  { %v987_v33 = vld [vmem:[%s1513_s0 + $0xf8] sm:$0xff]  ;;  %s1213_s0 = smov [#allocation2]  }
  0x13   :  { %s782_s2 = sshll.u32 %s1213_s0, 4  ;;  %s783_s2 = int_to_ptr.vmem [resolvable:$true] %s782_s2 }
  0x16   :  { %925 = vmatmul.msk.bf16.gmra.mxu0 %vm244_vm1, %v957_v6  ;;  %933 = vmatmul.msk.bf16.gmra.mxu1 %vm244_vm1, %v965_v7 }
  0x17   :  { %941 = vmatmul.msk.bf16.gmra.mxu2 %vm244_vm1, %v973_v8  ;;  %949 = vmatmul.msk.bf16.gmra.mxu3 %vm244_vm1, %v981_v9 }
  0x26   :  { %926 = vmatmul.msk.bf16.gmra.mxu0 %vm244_vm1, %v958_v10  ;;  %934 = vmatmul.msk.bf16.gmra.mxu1 %vm244_vm1, %v966_v11 }
  0x27   :  { %942 = vmatmul.msk.bf16.gmra.mxu2 %vm244_vm1, %v974_v12  ;;  %950 = vmatmul.msk.bf16.gmra.mxu3 %vm244_vm1, %v982_v13 }
  0x36   :  { %927 = vmatmul.msk.bf16.gmra.mxu0 %vm244_vm1, %v959_v14  ;;  %935 = vmatmul.msk.bf16.gmra.mxu1 %vm244_vm1, %v967_v15 }
  0x37   :  { %943 = vmatmul.msk.bf16.gmra.mxu2 %vm244_vm1, %v975_v16  ;;  %951 = vmatmul.msk.bf16.gmra.mxu3 %vm244_vm1, %v983_v17 }
  0x46   :  { %928 = vmatmul.msk.bf16.gmra.mxu0 %vm244_vm1, %v960_v18  ;;  %936 = vmatmul.msk.bf16.gmra.mxu1 %vm244_vm1, %v968_v19 }
  0x47   :  { %944 = vmatmul.msk.bf16.gmra.mxu2 %vm244_vm1, %v976_v20  ;;  %952 = vmatmul.msk.bf16.gmra.mxu3 %vm244_vm1, %v984_v21 }
  0x56   :  { %929 = vmatmul.msk.bf16.gmra.mxu0 %vm244_vm1, %v961_v22  ;;  %937 = vmatmul.msk.bf16.gmra.mxu1 %vm244_vm1, %v969_v23 }
  0x57   :  { %945 = vmatmul.msk.bf16.gmra.mxu2 %vm244_vm1, %v977_v24  ;;  %953 = vmatmul.msk.bf16.gmra.mxu3 %vm244_vm1, %v985_v25 }
  0x66   :  { %930 = vmatmul.msk.bf16.gmra.mxu0 %vm244_vm1, %v962_v26  ;;  %938 = vmatmul.msk.bf16.gmra.mxu1 %vm244_vm1, %v970_v27 }
  0x67   :  { %946 = vmatmul.msk.bf16.gmra.mxu2 %vm244_vm1, %v978_v28  ;;  %954 = vmatmul.msk.bf16.gmra.mxu3 %vm244_vm1, %v986_v29 }
  0x76   :  { %931 = vmatmul.msk.bf16.gmra.mxu0 %vm244_vm1, %v963_v30  ;;  %939 = vmatmul.msk.bf16.gmra.mxu1 %vm244_vm1, %v971_v31 }
  0x77   :  { %947 = vmatmul.msk.bf16.gmra.mxu2 %vm244_vm1, %v979_v32  ;;  %955 = vmatmul.msk.bf16.gmra.mxu3 %vm244_vm1, %v987_v33 }
  0x83   :  { %v354_v34 = vpop.f32.mrf.mxu0  ;;  %v394_v35 = vpop.f32.mrf.mxu1 }
  0x84   :  { %v518_v37 = vmul.f32 %v1375_v36, %v354_v34  ;;  %v534_v39 = vmul.f32 %v1375_v36, %v394_v35 }
  0x86   :  { %v586_v46 = vadd.f32 %v1381_v38, %v518_v37  ;;  %v602_v47 = vadd.f32 %v1381_v38, %v534_v39 }
  0x8a   :  { %v434_v40 = vpop.f32.mrf.mxu2  ;;  %v474_v41 = vpop.f32.mrf.mxu3 }
  0x8b   :  { %v356_v42 = vpop.f32.mrf.mxu0  ;;  %v396_v43 = vpop.f32.mrf.mxu1  ;;  %v550_v52 = vmul.f32 %v1375_v36, %v434_v40  ;;  %v566_v53 = vmul.f32 %v1375_v36, %v474_v41 }
  0x8c   :  { %v519_v44 = vmul.f32 %v1375_v36, %v356_v42  ;;  %v535_v45 = vmul.f32 %v1375_v36, %v396_v43 }
  0x8d   :  { %v618_v60 = vadd.f32 %v1381_v38, %v550_v52  ;;  %v634_v61 = vadd.f32 %v1381_v38, %v566_v53 }
  0x8e   :  { %v587_v48 = vadd.f32 %v1381_v38, %v519_v44  ;;  %v603_v49 = vadd.f32 %v1381_v38, %v535_v45 }
  0x90   :  { %v991_v50 = vpack.c.bf16 %v587_v48, %v586_v46  ;;  %v1031_v51 = vpack.c.bf16 %v603_v49, %v602_v47 }
  0x92   :  { %992 = vst [vmem:[#allocation2] sm:$0xff] %v991_v50   ;;  %v436_v54 = vpop.f32.mrf.mxu2  ;;  %v476_v55 = vpop.f32.mrf.mxu3 }
  0x93   :  { %1155 = vst [vmem:[#allocation2 + $0x40] sm:$0xff] %v1031_v51   ;;  %v551_v56 = vmul.f32 %v1375_v36, %v436_v54  ;;  %v567_v57 = vmul.f32 %v1375_v36, %v476_v55  ;;  %v359_v58 = vpop.f32.mrf.mxu0  ;;  %v399_v59 = vpop.f32.mrf.mxu1 }
  0x94   :  { %v520_v2 = vmul.f32 %v1375_v36, %v359_v58  ;;  %v536_v3 = vmul.f32 %v1375_v36, %v399_v59 }
  0x95   :  { %v619_v62 = vadd.f32 %v1381_v38, %v551_v56  ;;  %v635_v63 = vadd.f32 %v1381_v38, %v567_v57 }
  0x96   :  { %v588_v10 = vadd.f32 %v1381_v38, %v520_v2  ;;  %v604_v11 = vadd.f32 %v1381_v38, %v536_v3 }
  0x97   :  { %v1071_v0 = vpack.c.bf16 %v619_v62, %v618_v60  ;;  %v1111_v1 = vpack.c.bf16 %v635_v63, %v634_v61 }
  0x99   :  { %1163 = vst [vmem:[#allocation2 + $0x80] sm:$0xff] %v1071_v0  }
  0x9a   :  { %1171 = vst [vmem:[#allocation2 + $0xc0] sm:$0xff] %v1111_v1   ;;  %v439_v4 = vpop.f32.mrf.mxu2  ;;  %v479_v5 = vpop.f32.mrf.mxu3 }
  0x9b   :  { %v361_v6 = vpop.f32.mrf.mxu0  ;;  %v401_v7 = vpop.f32.mrf.mxu1  ;;  %v552_v16 = vmul.f32 %v1375_v36, %v439_v4  ;;  %v568_v17 = vmul.f32 %v1375_v36, %v479_v5 }
  0x9c   :  { %v521_v8 = vmul.f32 %v1375_v36, %v361_v6  ;;  %v537_v9 = vmul.f32 %v1375_v36, %v401_v7 }
  0x9d   :  { %v620_v24 = vadd.f32 %v1381_v38, %v552_v16  ;;  %v636_v25 = vadd.f32 %v1381_v38, %v568_v17 }
  0x9e   :  { %v589_v12 = vadd.f32 %v1381_v38, %v521_v8  ;;  %v605_v13 = vadd.f32 %v1381_v38, %v537_v9 }
  0xa0   :  { %v996_v14 = vpack.c.bf16 %v589_v12, %v588_v10  ;;  %v1036_v15 = vpack.c.bf16 %v605_v13, %v604_v11 }
  0xa2   :  { %1148 = vst [vmem:[#allocation2 + $0x8] sm:$0xff] %v996_v14   ;;  %v441_v18 = vpop.f32.mrf.mxu2  ;;  %v481_v19 = vpop.f32.mrf.mxu3 }
  0xa3   :  { %1156 = vst [vmem:[#allocation2 + $0x48] sm:$0xff] %v1036_v15   ;;  %v553_v20 = vmul.f32 %v1375_v36, %v441_v18  ;;  %v569_v21 = vmul.f32 %v1375_v36, %v481_v19  ;;  %v364_v22 = vpop.f32.mrf.mxu0  ;;  %v404_v23 = vpop.f32.mrf.mxu1 }
  0xa4   :  { %v522_v30 = vmul.f32 %v1375_v36, %v364_v22  ;;  %v538_v31 = vmul.f32 %v1375_v36, %v404_v23 }
  0xa5   :  { %v621_v26 = vadd.f32 %v1381_v38, %v553_v20  ;;  %v637_v27 = vadd.f32 %v1381_v38, %v569_v21 }
  0xa6   :  { %v590_v40 = vadd.f32 %v1381_v38, %v522_v30  ;;  %v606_v41 = vadd.f32 %v1381_v38, %v538_v31 }
  0xa7   :  { %v1076_v28 = vpack.c.bf16 %v621_v26, %v620_v24  ;;  %v1116_v29 = vpack.c.bf16 %v637_v27, %v636_v25 }
  0xa9   :  { %1164 = vst [vmem:[#allocation2 + $0x88] sm:$0xff] %v1076_v28  }
  0xaa   :  { %1172 = vst [vmem:[#allocation2 + $0xc8] sm:$0xff] %v1116_v29   ;;  %v444_v32 = vpop.f32.mrf.mxu2  ;;  %v484_v33 = vpop.f32.mrf.mxu3 }
  0xab   :  { %v366_v34 = vpop.f32.mrf.mxu0  ;;  %v406_v35 = vpop.f32.mrf.mxu1  ;;  %v554_v46 = vmul.f32 %v1375_v36, %v444_v32  ;;  %v570_v47 = vmul.f32 %v1375_v36, %v484_v33 }
  0xac   :  { %v523_v37 = vmul.f32 %v1375_v36, %v366_v34  ;;  %v539_v39 = vmul.f32 %v1375_v36, %v406_v35 }
  0xad   :  { %v622_v54 = vadd.f32 %v1381_v38, %v554_v46  ;;  %v638_v55 = vadd.f32 %v1381_v38, %v570_v47 }
  0xae   :  { %v591_v42 = vadd.f32 %v1381_v38, %v523_v37  ;;  %v607_v43 = vadd.f32 %v1381_v38, %v539_v39 }
  0xb0   :  { %v1001_v44 = vpack.c.bf16 %v591_v42, %v590_v40  ;;  %v1041_v45 = vpack.c.bf16 %v607_v43, %v606_v41 }
  0xb2   :  { %1149 = vst [vmem:[#allocation2 + $0x10] sm:$0xff] %v1001_v44   ;;  %v446_v48 = vpop.f32.mrf.mxu2  ;;  %v486_v49 = vpop.f32.mrf.mxu3 }
  0xb3   :  { %1157 = vst [vmem:[#allocation2 + $0x50] sm:$0xff] %v1041_v45   ;;  %v555_v50 = vmul.f32 %v1375_v36, %v446_v48  ;;  %v571_v51 = vmul.f32 %v1375_v36, %v486_v49  ;;  %v369_v52 = vpop.f32.mrf.mxu0  ;;  %v409_v53 = vpop.f32.mrf.mxu1 }
  0xb4   :  { %v524_v60 = vmul.f32 %v1375_v36, %v369_v52  ;;  %v540_v61 = vmul.f32 %v1375_v36, %v409_v53 }
  0xb5   :  { %v623_v56 = vadd.f32 %v1381_v38, %v555_v50  ;;  %v639_v57 = vadd.f32 %v1381_v38, %v571_v51 }
  0xb6   :  { %v592_v4 = vadd.f32 %v1381_v38, %v524_v60  ;;  %v608_v5 = vadd.f32 %v1381_v38, %v540_v61 }
  0xb7   :  { %v1081_v58 = vpack.c.bf16 %v623_v56, %v622_v54  ;;  %v1121_v59 = vpack.c.bf16 %v639_v57, %v638_v55 }
  0xb9   :  { %1165 = vst [vmem:[#allocation2 + $0x90] sm:$0xff] %v1081_v58  }
  0xba   :  { %1173 = vst [vmem:[#allocation2 + $0xd0] sm:$0xff] %v1121_v59   ;;  %v449_v62 = vpop.f32.mrf.mxu2  ;;  %v489_v63 = vpop.f32.mrf.mxu3 }
  0xbb   :  { %v371_v0 = vpop.f32.mrf.mxu0  ;;  %v411_v1 = vpop.f32.mrf.mxu1  ;;  %v556_v10 = vmul.f32 %v1375_v36, %v449_v62  ;;  %v572_v11 = vmul.f32 %v1375_v36, %v489_v63 }
  0xbc   :  { %v525_v2 = vmul.f32 %v1375_v36, %v371_v0  ;;  %v541_v3 = vmul.f32 %v1375_v36, %v411_v1 }
  0xbd   :  { %v624_v18 = vadd.f32 %v1381_v38, %v556_v10  ;;  %v640_v19 = vadd.f32 %v1381_v38, %v572_v11 }
  0xbe   :  { %v593_v6 = vadd.f32 %v1381_v38, %v525_v2  ;;  %v609_v7 = vadd.f32 %v1381_v38, %v541_v3 }
  0xc0   :  { %v1006_v8 = vpack.c.bf16 %v593_v6, %v592_v4  ;;  %v1046_v9 = vpack.c.bf16 %v609_v7, %v608_v5 }
  0xc2   :  { %1150 = vst [vmem:[#allocation2 + $0x18] sm:$0xff] %v1006_v8   ;;  %v451_v12 = vpop.f32.mrf.mxu2  ;;  %v491_v13 = vpop.f32.mrf.mxu3 }
  0xc3   :  { %1158 = vst [vmem:[#allocation2 + $0x58] sm:$0xff] %v1046_v9   ;;  %v557_v14 = vmul.f32 %v1375_v36, %v451_v12  ;;  %v573_v15 = vmul.f32 %v1375_v36, %v491_v13  ;;  %v374_v16 = vpop.f32.mrf.mxu0  ;;  %v414_v17 = vpop.f32.mrf.mxu1 }
  0xc4   :  { %v526_v24 = vmul.f32 %v1375_v36, %v374_v16  ;;  %v542_v25 = vmul.f32 %v1375_v36, %v414_v17 }
  0xc5   :  { %v625_v20 = vadd.f32 %v1381_v38, %v557_v14  ;;  %v641_v21 = vadd.f32 %v1381_v38, %v573_v15 }
  0xc6   :  { %v594_v32 = vadd.f32 %v1381_v38, %v526_v24  ;;  %v610_v33 = vadd.f32 %v1381_v38, %v542_v25 }
  0xc7   :  { %v1086_v22 = vpack.c.bf16 %v625_v20, %v624_v18  ;;  %v1126_v23 = vpack.c.bf16 %v641_v21, %v640_v19 }
  0xc9   :  { %1166 = vst [vmem:[#allocation2 + $0x98] sm:$0xff] %v1086_v22  }
  0xca   :  { %1174 = vst [vmem:[#allocation2 + $0xd8] sm:$0xff] %v1126_v23   ;;  %v454_v26 = vpop.f32.mrf.mxu2  ;;  %v494_v27 = vpop.f32.mrf.mxu3 }
  0xcb   :  { %v376_v28 = vpop.f32.mrf.mxu0  ;;  %v416_v29 = vpop.f32.mrf.mxu1  ;;  %v558_v40 = vmul.f32 %v1375_v36, %v454_v26  ;;  %v574_v41 = vmul.f32 %v1375_v36, %v494_v27 }
  0xcc   :  { %v527_v30 = vmul.f32 %v1375_v36, %v376_v28  ;;  %v543_v31 = vmul.f32 %v1375_v36, %v416_v29 }
  0xcd   :  { %v626_v48 = vadd.f32 %v1381_v38, %v558_v40  ;;  %v642_v49 = vadd.f32 %v1381_v38, %v574_v41 }
  0xce   :  { %v595_v34 = vadd.f32 %v1381_v38, %v527_v30  ;;  %v611_v35 = vadd.f32 %v1381_v38, %v543_v31 }
  0xd0   :  { %v1011_v37 = vpack.c.bf16 %v595_v34, %v594_v32  ;;  %v1051_v39 = vpack.c.bf16 %v611_v35, %v610_v33 }
  0xd2   :  { %1151 = vst [vmem:[#allocation2 + $0x20] sm:$0xff] %v1011_v37   ;;  %v456_v42 = vpop.f32.mrf.mxu2  ;;  %v496_v43 = vpop.f32.mrf.mxu3 }
  0xd3   :  { %1159 = vst [vmem:[#allocation2 + $0x60] sm:$0xff] %v1051_v39   ;;  %v559_v44 = vmul.f32 %v1375_v36, %v456_v42  ;;  %v575_v45 = vmul.f32 %v1375_v36, %v496_v43  ;;  %v379_v46 = vpop.f32.mrf.mxu0  ;;  %v419_v47 = vpop.f32.mrf.mxu1 }
  0xd4   :  { %v528_v54 = vmul.f32 %v1375_v36, %v379_v46  ;;  %v544_v55 = vmul.f32 %v1375_v36, %v419_v47 }
  0xd5   :  { %v627_v50 = vadd.f32 %v1381_v38, %v559_v44  ;;  %v643_v51 = vadd.f32 %v1381_v38, %v575_v45 }
  0xd6   :  { %v596_v62 = vadd.f32 %v1381_v38, %v528_v54  ;;  %v612_v63 = vadd.f32 %v1381_v38, %v544_v55 }
  0xd7   :  { %v1091_v52 = vpack.c.bf16 %v627_v50, %v626_v48  ;;  %v1131_v53 = vpack.c.bf16 %v643_v51, %v642_v49 }
  0xd9   :  { %1167 = vst [vmem:[#allocation2 + $0xa0] sm:$0xff] %v1091_v52  }
  0xda   :  { %1175 = vst [vmem:[#allocation2 + $0xe0] sm:$0xff] %v1131_v53   ;;  %v459_v56 = vpop.f32.mrf.mxu2  ;;  %v499_v57 = vpop.f32.mrf.mxu3 }
  0xdb   :  { %v381_v58 = vpop.f32.mrf.mxu0  ;;  %v421_v59 = vpop.f32.mrf.mxu1  ;;  %v560_v4 = vmul.f32 %v1375_v36, %v459_v56  ;;  %v576_v5 = vmul.f32 %v1375_v36, %v499_v57 }
  0xdc   :  { %v529_v60 = vmul.f32 %v1375_v36, %v381_v58  ;;  %v545_v61 = vmul.f32 %v1375_v36, %v421_v59 }
  0xdd   :  { %v628_v12 = vadd.f32 %v1381_v38, %v560_v4  ;;  %v644_v13 = vadd.f32 %v1381_v38, %v576_v5 }
  0xde   :  { %v597_v0 = vadd.f32 %v1381_v38, %v529_v60  ;;  %v613_v1 = vadd.f32 %v1381_v38, %v545_v61 }
  0xe0   :  { %v1016_v2 = vpack.c.bf16 %v597_v0, %v596_v62  ;;  %v1056_v3 = vpack.c.bf16 %v613_v1, %v612_v63 }
  0xe2   :  { %1152 = vst [vmem:[#allocation2 + $0x28] sm:$0xff] %v1016_v2   ;;  %v461_v6 = vpop.f32.mrf.mxu2  ;;  %v501_v7 = vpop.f32.mrf.mxu3 }
  0xe3   :  { %1160 = vst [vmem:[#allocation2 + $0x68] sm:$0xff] %v1056_v3   ;;  %v561_v8 = vmul.f32 %v1375_v36, %v461_v6  ;;  %v577_v9 = vmul.f32 %v1375_v36, %v501_v7  ;;  %v384_v10 = vpop.f32.mrf.mxu0  ;;  %v424_v11 = vpop.f32.mrf.mxu1 }
  0xe4   :  { %v530_v18 = vmul.f32 %v1375_v36, %v384_v10  ;;  %v546_v19 = vmul.f32 %v1375_v36, %v424_v11 }
  0xe5   :  { %v629_v14 = vadd.f32 %v1381_v38, %v561_v8  ;;  %v645_v15 = vadd.f32 %v1381_v38, %v577_v9 }
  0xe6   :  { %v598_v26 = vadd.f32 %v1381_v38, %v530_v18  ;;  %v614_v27 = vadd.f32 %v1381_v38, %v546_v19 }
  0xe7   :  { %v1096_v16 = vpack.c.bf16 %v629_v14, %v628_v12  ;;  %v1136_v17 = vpack.c.bf16 %v645_v15, %v644_v13 }
  0xe9   :  { %1168 = vst [vmem:[#allocation2 + $0xa8] sm:$0xff] %v1096_v16  }
  0xea   :  { %1176 = vst [vmem:[#allocation2 + $0xe8] sm:$0xff] %v1136_v17   ;;  %v464_v20 = vpop.f32.mrf.mxu2  ;;  %v504_v21 = vpop.f32.mrf.mxu3 }
  0xeb   :  { %v386_v22 = vpop.f32.mrf.mxu0  ;;  %v426_v23 = vpop.f32.mrf.mxu1  ;;  %v562_v32 = vmul.f32 %v1375_v36, %v464_v20  ;;  %v578_v33 = vmul.f32 %v1375_v36, %v504_v21 }
  0xec   :  { %v531_v24 = vmul.f32 %v1375_v36, %v386_v22  ;;  %v547_v25 = vmul.f32 %v1375_v36, %v426_v23 }
  0xed   :  { %v630_v42 = vadd.f32 %v1381_v38, %v562_v32  ;;  %v646_v43 = vadd.f32 %v1381_v38, %v578_v33 }
  0xee   :  { %v599_v28 = vadd.f32 %v1381_v38, %v531_v24  ;;  %v615_v29 = vadd.f32 %v1381_v38, %v547_v25 }
  0xf0   :  { %v1021_v30 = vpack.c.bf16 %v599_v28, %v598_v26  ;;  %v1061_v31 = vpack.c.bf16 %v615_v29, %v614_v27 }
  0xf2   :  { %1153 = vst [vmem:[#allocation2 + $0x30] sm:$0xff] %v1021_v30   ;;  %v466_v34 = vpop.f32.mrf.mxu2  ;;  %v506_v35 = vpop.f32.mrf.mxu3 }
  0xf3   :  { %1161 = vst [vmem:[#allocation2 + $0x70] sm:$0xff] %v1061_v31   ;;  %v563_v37 = vmul.f32 %v1375_v36, %v466_v34  ;;  %v579_v39 = vmul.f32 %v1375_v36, %v506_v35  ;;  %v389_v40 = vpop.f32.mrf.mxu0  ;;  %v429_v41 = vpop.f32.mrf.mxu1 }
  0xf4   :  { %v532_v48 = vmul.f32 %v1375_v36, %v389_v40  ;;  %v548_v49 = vmul.f32 %v1375_v36, %v429_v41 }
  0xf5   :  { %v631_v44 = vadd.f32 %v1381_v38, %v563_v37  ;;  %v647_v45 = vadd.f32 %v1381_v38, %v579_v39 }
  0xf6   :  { %v600_v56 = vadd.f32 %v1381_v38, %v532_v48  ;;  %v616_v57 = vadd.f32 %v1381_v38, %v548_v49 }
  0xf7   :  { %v1101_v46 = vpack.c.bf16 %v631_v44, %v630_v42  ;;  %v1141_v47 = vpack.c.bf16 %v647_v45, %v646_v43 }
  0xf9   :  { %1169 = vst [vmem:[#allocation2 + $0xb0] sm:$0xff] %v1101_v46  }
  0xfa   :  { %1177 = vst [vmem:[#allocation2 + $0xf0] sm:$0xff] %v1141_v47   ;;  %v469_v50 = vpop.f32.mrf.mxu2  ;;  %v509_v51 = vpop.f32.mrf.mxu3 }
  0xfb   :  { %v391_v52 = vpop.f32.mrf.mxu0  ;;  %v431_v53 = vpop.f32.mrf.mxu1  ;;  %v564_v62 = vmul.f32 %v1375_v36, %v469_v50  ;;  %v580_v63 = vmul.f32 %v1375_v36, %v509_v51 }
  0xfc   :  { %v533_v54 = vmul.f32 %v1375_v36, %v391_v52  ;;  %v549_v55 = vmul.f32 %v1375_v36, %v431_v53 }
  0xfd   :  { %v632_v4 = vadd.f32 %v1381_v38, %v564_v62  ;;  %v648_v5 = vadd.f32 %v1381_v38, %v580_v63 }
  0xfe   :  { %v601_v58 = vadd.f32 %v1381_v38, %v533_v54  ;;  %v617_v59 = vadd.f32 %v1381_v38, %v549_v55 }
 0x100   :  { %v1026_v60 = vpack.c.bf16 %v601_v58, %v600_v56  ;;  %v1066_v61 = vpack.c.bf16 %v617_v59, %v616_v57 }
 0x102   :  { %1154 = vst [vmem:[#allocation2 + $0x38] sm:$0xff] %v1026_v60   ;;  %v471_v0 = vpop.f32.mrf.mxu2  ;;  %v511_v1 = vpop.f32.mrf.mxu3 }
 0x103   :  { %1162 = vst [vmem:[#allocation2 + $0x78] sm:$0xff] %v1066_v61   ;;  %v565_v2 = vmul.f32 %v1375_v36, %v471_v0  ;;  %v581_v3 = vmul.f32 %v1375_v36, %v511_v1 }
 0x105   :  { %v633_v6 = vadd.f32 %v1381_v38, %v565_v2  ;;  %v649_v7 = vadd.f32 %v1381_v38, %v581_v3 }
 0x107   :  { %v1106_v8 = vpack.c.bf16 %v633_v6, %v632_v4  ;;  %v1146_v9 = vpack.c.bf16 %v649_v7, %v648_v5 }
 0x109   :  { %1170 = vst [vmem:[#allocation2 + $0xb8] sm:$0xff] %v1106_v8  }
 0x10a   :  { %1178 = vst [vmem:[#allocation2 + $0xf8] sm:$0xff] %v1146_v9  }
 0x10b   :  { %790 = dma.vmem_to_hbm [thread:$0]  %s783_s2, 4096, %s785_s5, [#allocation3], %s1214_s6, %s1214_s6, %s1215_s7  }
 0x10c   :  { %1211 = dma.done.wait [#allocation3], 4096  }
 0x10d   :  { %1212 = vsyncadd [#allocation3], 4294963200 }
 0x10e   :  { %795 = vsyncpa [#allocation3], 1 }

</bundles_post_ra>
